<compile_context>
chip_gen: v7x
topology: tpu7x:2x2x1
jax: 0.10.0
libtpu: 0.0.40
codegen_flags: <defaults>
</compile_context>

<pallas_src>
import functools

import numpy as np
import jax
import jax.numpy as jnp
from jax.experimental import pallas as pl
from jax.experimental.pallas import tpu as pltpu

LANE = 128
SUBLANE = 8
VMEM_LIMIT = 32 * 1024 * 1024  # leaves headroom on v7x's 64 MiB physical VMEM


def _round_up(x, m):
    return ((x + m - 1) // m) * m


# ----------------------------------------------------------------------------
# Kernel 1: fused node-linear + sheaf-learner projections (one MXU matmul)
# ----------------------------------------------------------------------------
def fused_linear_kernel(x_ref, w_ref, b_ref, y_ref):
    """y = bf16(x) @ W_pad + b_pad.

    The sheaf-learner weight halves wl / wr are folded into the otherwise
    unused columns D and D+1 of W_pad, so this single matmul also produces the
    per-node projections pr = x @ wl (lane D) and pc = x @ wr (lane D+1).
    The f32 -> bf16 cast is done in-kernel (free VPU convert)."""
    x = x_ref[...].astype(jnp.bfloat16)
    y_ref[...] = (jnp.dot(x, w_ref[...], preferred_element_type=jnp.float32)
                  + b_ref[...])


def pallas_fused_linear(x_pad, w_bf16, b_pad, *, tn):
    n_pad, dp = x_pad.shape
    grid = (n_pad // tn,)
    flops = 2 * n_pad * dp * dp
    bytes_accessed = 4 * n_pad * dp + 2 * dp * dp + 4 * dp + 4 * n_pad * dp
    return pl.pallas_call(
        fused_linear_kernel,
        out_shape=jax.ShapeDtypeStruct((n_pad, dp), jnp.float32),
        grid=grid,
        in_specs=[pl.BlockSpec((tn, dp), lambda i: (i, 0)),
                  pl.BlockSpec((dp, dp), lambda i: (0, 0)),
                  pl.BlockSpec((1, dp), lambda i: (0, 0))],
        out_specs=pl.BlockSpec((tn, dp), lambda i: (i, 0)),
        compiler_params=pltpu.CompilerParams(
            dimension_semantics=("parallel",),
            vmem_limit_bytes=VMEM_LIMIT),
        cost_estimate=pl.CostEstimate(flops=int(flops), transcendentals=0,
                                      bytes_accessed=int(bytes_accessed)),
    )(x_pad, w_bf16, b_pad)


# ----------------------------------------------------------------------------
# Kernel 2: CSR SpMM (sparse sheaf-Laplacian @ y) with fused combine epilogue
# ----------------------------------------------------------------------------
def spmm_combine_kernel(tileptr_ref, dst_ref, col_ref, coef_ref,
                        x_ref, y_ref, diag_ref, y_hbm_ref,
                        o_ref, acc_ref, gbuf_ref, sem_ref, *, step_size):
    """Per destination-row tile i (rows [i*tn, (i+1)*tn)):

        agg[r, :] = sum_{e : dst[e] == r} coef[e] * y[col[e], :]
        x_out     = x - step_size * (diag * y + agg)

    Edge metadata (CSR tile offsets, dst rows, src cols, coefficients) is
    SMEM-resident; y rows are gathered from HBM with double-buffered async
    copies; the accumulator tile stays in VMEM and the combine is fused into
    the epilogue so agg never touches HBM."""
    i = pl.program_id(0)
    tn = x_ref.shape[0]
    row0 = i * tn
    base = tileptr_ref[i]
    n_e = tileptr_ref[i + 1] - base

    acc_ref[...] = jnp.zeros_like(acc_ref)

    def start_fetch(e_local, slot):
        c = col_ref[base + e_local]
        pltpu.make_async_copy(y_hbm_ref.at[pl.ds(c, 1), :],
                              gbuf_ref.at[slot],
                              sem_ref.at[slot]).start()

    @pl.when(n_e > 0)
    def _():
        start_fetch(0, 0)

    def edge_body(e_local, carry):
        slot = e_local % 2
        pltpu.make_async_copy(y_hbm_ref.at[pl.ds(0, 1), :],
                              gbuf_ref.at[slot],
                              sem_ref.at[slot]).wait()

        @pl.when(e_local + 1 < n_e)
        def _():
            start_fetch(e_local + 1, 1 - slot)

        coef = coef_ref[base + e_local]             # f32 scalar from SMEM
        r = dst_ref[base + e_local] - row0          # local destination row
        cur = acc_ref[pl.ds(r, 1), :]
        acc_ref[pl.ds(r, 1), :] = cur + coef * gbuf_ref[slot]
        return carry

    jax.lax.fori_loop(0, n_e, edge_body, 0)

    # Fused combine epilogue: no separate HBM pass over agg / x / y.
    o_ref[...] = x_ref[...] - step_size * (diag_ref[...] * y_ref[...]
                                           + acc_ref[...])


def pallas_spmm_combine(tileptr, dst, col, coef, x_pad, y_pad, diag_col,
                        step_size, *, tn):
    n_pad, dp = x_pad.shape
    num_tiles = n_pad // tn
    n_edges = int(col.shape[0])
    kernel = functools.partial(spmm_combine_kernel, step_size=step_size)
    smem = pl.BlockSpec(memory_space=pltpu.MemorySpace.SMEM)
    flops = 2 * n_edges * dp + 3 * n_pad * dp
    bytes_accessed = (n_edges * (4 * dp + 12)       # gathered y rows + metadata
                      + 3 * 4 * n_pad * dp + 4 * n_pad)
    # TODO(synk): for very large edge lists, chunk the SMEM edge metadata per
    #             row tile instead of keeping the full arrays SMEM-resident.
    return pl.pallas_call(
        kernel,
        out_shape=jax.ShapeDtypeStruct((n_pad, dp), jnp.float32),
        grid=(num_tiles,),
        in_specs=[smem, smem, smem, smem,
                  pl.BlockSpec((tn, dp), lambda i: (i, 0)),
                  pl.BlockSpec((tn, dp), lambda i: (i, 0)),
                  pl.BlockSpec((tn, 1), lambda i: (i, 0)),
                  pl.BlockSpec(memory_space=pl.ANY)],
        out_specs=pl.BlockSpec((tn, dp), lambda i: (i, 0)),
        scratch_shapes=[pltpu.VMEM((tn, dp), jnp.float32),     # accumulator
                        pltpu.VMEM((2, 1, dp), jnp.float32),   # gather buffers
                        pltpu.SemaphoreType.DMA((2,))],
        compiler_params=pltpu.CompilerParams(
            dimension_semantics=("parallel",),
            vmem_limit_bytes=VMEM_LIMIT),
        cost_estimate=pl.CostEstimate(flops=int(flops), transcendentals=0,
                                      bytes_accessed=int(bytes_accessed)),
    )(tileptr, dst, col, coef, x_pad, y_pad, diag_col, y_pad)


# ----------------------------------------------------------------------------
# Graph bookkeeping (pure Python / numpy glue)
# ----------------------------------------------------------------------------
def compute_left_right_map_index(edge_index_np):
    """Port of SheafConvLayer.compute_left_right_map_index, failing loudly if
    any edge lacks its reverse (correctness-review request)."""
    edge_to_idx = {}
    E = edge_index_np.shape[1]
    for e in range(E):
        edge_to_idx[(int(edge_index_np[0, e]), int(edge_index_np[1, e]))] = e
    left_index, right_index = [], []
    for e in range(E):
        s = int(edge_index_np[0, e])
        t = int(edge_index_np[1, e])
        if (t, s) not in edge_to_idx:
            raise ValueError(
                f"edge ({s}, {t}) has no reverse edge ({t}, {s}); the sheaf "
                "Laplacian construction requires a symmetric edge list")
        left_index.append(e)
        right_index.append(edge_to_idx[(t, s)])
    return np.asarray(left_index, np.int32), np.asarray(right_index, np.int32)


# ----------------------------------------------------------------------------
# Model
# ----------------------------------------------------------------------------
class RecSysGNNSheafPallas:
    def __init__(self, latent_dim, num_layers, num_users, num_items,
                 edge_index_np, step_size=1.0, seed=0):
        self.D = latent_dim
        # +2 lanes so the sheaf-learner projections fold into the node-linear
        # weight (single MXU matmul produces y, pr, pc).
        # TODO(synk): for D << 128, pack multiple nodes per 128-lane row with a
        #             block-diagonal weight to recover the lane-padding waste.
        self.Dp = _round_up(latent_dim + 2, LANE)
        self.num_layers = num_layers
        self.N = num_users + num_items
        # HBM-bound kernels want big row tiles (perf review: 1024-2048).
        self.tn = 1024 if self.N >= 1024 else _round_up(self.N, SUBLANE)
        self.Np = _round_up(self.N, self.tn)
        self.num_tiles = self.Np // self.tn
        self.step_size = float(step_size)

        # CSR-sort edges by destination row ONCE; all downstream per-edge
        # arrays (maps, right_idx, norm_maps) live in this sorted order.
        ei = np.asarray(edge_index_np, np.int64)
        order = np.argsort(ei[0], kind="stable")
        ei = ei[:, order]
        row_np = ei[0].astype(np.int32)
        col_np = ei[1].astype(np.int32)
        _, right_np = compute_left_right_map_index(ei)
        tileptr_np = np.searchsorted(
            row_np, np.arange(self.num_tiles + 1) * self.tn,
            side="left").astype(np.int32)

        self.row = jnp.asarray(row_np)          # destination (CSR-sorted)
        self.col = jnp.asarray(col_np)          # source
        self.right_idx = jnp.asarray(right_np)  # index of reverse edge
        self.tileptr = jnp.asarray(tileptr_np)  # per-row-tile CSR offsets

        key = jax.random.PRNGKey(seed)
        k_emb, *k_layers = jax.random.split(key, 1 + 2 * num_layers)
        # nn.init.normal_(embedding.weight, std=0.1)
        self.embedding = 0.1 * jax.random.normal(
            k_emb, (self.N, latent_dim), jnp.float32)

        D, Dp = self.D, self.Dp
        self.layer_params = []
        for l in range(num_layers):
            k_w, k_s = k_layers[2 * l], k_layers[2 * l + 1]
            bound = 1.0 / np.sqrt(D)
            w = jax.random.uniform(k_w, (D, D), jnp.float32, -bound, bound)
            b = jnp.zeros((D,), jnp.float32)
            bound_s = 1.0 / np.sqrt(2 * D)
            w_sheaf = jax.random.uniform(k_s, (1, 2 * D), jnp.float32,
                                         -bound_s, bound_s)
            # Transposed, lane-padded, bf16 weight with wl / wr folded into
            # columns D and D+1 (sheaf learner has no bias -> b_pad stays 0).
            w_pad = (jnp.zeros((Dp, Dp), jnp.float32)
                     .at[:D, :D].set(w.T)
                     .at[:D, D].set(w_sheaf[0, :D])
                     .at[:D, D + 1].set(w_sheaf[0, D:]))
            b_pad = jnp.zeros((1, Dp), jnp.float32).at[0, :D].set(b)
            self.layer_params.append({
                "w_pad": w_pad.astype(jnp.bfloat16),
                "b_pad": b_pad,
            })

    # ------------------------------------------------------------------ layer
    def _sheaf_conv(self, x_pad, p):
        # 1) Fused node linear + sheaf projections (single MXU matmul,
        #    bf16-in / f32-acc; cast done in-kernel).
        y_pad = pallas_fused_linear(x_pad, p["w_pad"], p["b_pad"], tn=self.tn)
        pr = y_pad[:, self.D]          # x @ wl  (per node)
        pc = y_pad[:, self.D + 1]      # x @ wr  (per node)
        # NOTE: lanes D, D+1 of y_pad (and hence of x_pad next layer) are
        # nonzero; benign since all weight rows >= D are zero.

        # 2) Restriction maps + normalised Laplacian coefficients (O(E) glue).
        # TODO(synk): fuse this into a two-pass edge sweep inside the SpMM
        #             kernel; norm_maps needs a global degree pass first.
        maps = jnp.tanh(pr[self.row] + pc[self.col])                 # (E,)
        maps_rev = maps[self.right_idx]
        diag_maps = jax.ops.segment_sum(maps * maps, self.row,
                                        num_segments=self.Np)        # (Np,)
        d_sqrt_inv = (diag_maps + 1.0) ** -0.5
        norm_maps = -(d_sqrt_inv[self.row] * maps * maps_rev
                      * d_sqrt_inv[self.col])                        # (E,)
        diag = d_sqrt_inv * diag_maps * d_sqrt_inv                   # (Np,)

        # 3+4) Fused sparse (L @ y) + combine in one Pallas kernel.
        return pallas_spmm_combine(self.tileptr, self.row, self.col,
                                   norm_maps, x_pad, y_pad, diag[:, None],
                                   self.step_size, tn=self.tn)

    # ---------------------------------------------------------------- forward
    def forward(self, embedding):
        emb0 = embedding                                             # (N, D)
        x = (jnp.zeros((self.Np, self.Dp), jnp.float32)
             .at[:self.N, :self.D].set(emb0))                        # padded
        embs = [emb0]
        for p in self.layer_params:
            x = self._sheaf_conv(x, p)
            embs.append(x[:self.N, :self.D])
        out = jnp.concatenate(embs, axis=-1)                         # sheaf: concat
        return emb0, out


# ----------------------------------------------------------------------------
# Pure-JAX reference (same bf16-rounded weights / x cast) for validation
# ----------------------------------------------------------------------------
def reference_forward(model, embedding):
    D = model.D
    row, col, ridx = model.row, model.col, model.right_idx
    x = embedding.astype(jnp.float32)
    embs = [x]
    for p in model.layer_params:
        w_full = p["w_pad"].astype(jnp.float32)
        Wt = w_full[:D, :D]
        wl = w_full[:D, D]
        wr = w_full[:D, D + 1]
        b = p["b_pad"][0, :D]
        x_b = x.astype(jnp.bfloat16).astype(jnp.float32)
        y = x_b @ Wt + b
        pr = x_b @ wl
        pc = x_b @ wr
        maps = jnp.tanh(pr[row] + pc[col])
        diag_maps = jax.ops.segment_sum(maps * maps, row,
                                        num_segments=model.N)
        dsi = (diag_maps + 1.0) ** -0.5
        norm = -(dsi[row] * maps * maps[ridx] * dsi[col])
        agg = jax.ops.segment_sum(norm[:, None] * y[col], row,
                                  num_segments=model.N)
        Ly = (dsi * diag_maps * dsi)[:, None] * y + agg
        x = x - model.step_size * Ly
        embs.append(x)
    return embedding, jnp.concatenate(embs, axis=-1)


# ----------------------------------------------------------------------------
# Main
# ----------------------------------------------------------------------------
if __name__ == "__main__":
    num_users, num_items = 8, 8
    latent_dim = 32
    num_layers = 2
    N = num_users + num_items

    # Deterministic ring graph with both edge directions present (every edge
    # (s, t) needs its reverse (t, s) for the sheaf right_idx).
    src = np.arange(N)
    dst = (src + 1) % N
    edge_index = np.concatenate(
        [np.stack([src, dst]), np.stack([dst, src])], axis=1).astype(np.int64)

    model = RecSysGNNSheafPallas(latent_dim, num_layers, num_users, num_items,
                                 edge_index, step_size=1.0, seed=0)

    fwd = jax.jit(model.forward)
    emb0, out = fwd(model.embedding)
    jax.block_until_ready((emb0, out))

    assert emb0.shape == (N, latent_dim)
    assert out.shape == (N, latent_dim * (num_layers + 1))
    assert bool(jnp.all(jnp.isfinite(out)))

    # End-to-end validation against a pure-JAX reference using the same
    # bf16-rounded weights / in-kernel x cast.
    ref_emb0, ref_out = reference_forward(model, model.embedding)
    np.testing.assert_allclose(np.asarray(out), np.asarray(ref_out),
                               rtol=5e-3, atol=5e-3)

    print("KERNEL_OK")
</pallas_src>

<mosaic_0001>
module attributes {stable_mosaic.version = 11 : i64} {
  func.func private @main(%arg0: i32) attributes {dimension_semantics = [#tpu.dimension_semantics<core_parallel>], iteration_bounds = array<i64: 2>, tpu.core_type = #tpu.core_type<sc_scalar_subcore>, window_params = []} {
    return
  }
}

module attributes {stable_mosaic.version = 11 : i64} {
  func.func private @main(%arg0: i32) attributes {dimension_semantics = [#tpu.dimension_semantics<core_parallel>], iteration_bounds = array<i64: 2>, tpu.core_type = #tpu.core_type<sc_scalar_subcore>, window_params = []} {
    return
  }
}

module attributes {stable_mosaic.version = 11 : i64} {
  func.func @fused_linear_kernel(%arg0: i32, %arg1: memref<16x128xf32, #tpu.memory_space<vmem>>, %arg2: memref<128x128xbf16, #tpu.memory_space<vmem>>, %arg3: memref<1x128xf32, #tpu.memory_space<vmem>>, %arg4: memref<16x128xf32, #tpu.memory_space<vmem>>) attributes {dimension_semantics = [#tpu.dimension_semantics<parallel>], iteration_bounds = array<i64: 1>, scalar_prefetch = 0 : i64, scratch_operands = 0 : i64, tpu.core_type = #tpu.core_type<tc>, window_params = [{transform_indices = @transform_0, window_bounds = array<i64: 16, 128>}, {pipeline_mode = #tpu.pipeline_mode<synchronous>, transform_indices = @transform_1, window_bounds = array<i64: 128, 128>}, {pipeline_mode = #tpu.pipeline_mode<synchronous>, transform_indices = @transform_2, window_bounds = array<i64: 1, 128>}, {transform_indices = @transform_3, window_bounds = array<i64: 16, 128>}]} {
    %c0 = arith.constant 0 : index
    %c0_0 = arith.constant 0 : index
    %0 = vector.load %arg1[%c0, %c0_0] : memref<16x128xf32, #tpu.memory_space<vmem>>, vector<16x128xf32>
    %1 = arith.truncf %0 : vector<16x128xf32> to vector<16x128xbf16>
    %c0_1 = arith.constant 0 : index
    %c0_2 = arith.constant 0 : index
    %2 = vector.load %arg2[%c0_1, %c0_2] : memref<128x128xbf16, #tpu.memory_space<vmem>>, vector<128x128xbf16>
    %cst = arith.constant dense<0.000000e+00> : vector<16x128xf32>
    %3 = tpu.matmul %1, %2, %cst {dimension_numbers = #tpu.dot_dimension_numbers<[1], [0], [0], [1], [0, 0, 1, 1], [], []>} : vector<16x128xbf16>, vector<128x128xbf16>, vector<16x128xf32> -> vector<16x128xf32>
    %c0_3 = arith.constant 0 : index
    %c0_4 = arith.constant 0 : index
    %4 = vector.load %arg3[%c0_3, %c0_4] : memref<1x128xf32, #tpu.memory_space<vmem>>, vector<1x128xf32>
    %5 = vector.broadcast %4 : vector<1x128xf32> to vector<16x128xf32>
    %6 = arith.addf %3, %5 : vector<16x128xf32>
    %c0_5 = arith.constant 0 : index
    %c0_6 = arith.constant 0 : index
    %7 = vector.load %arg4[%c0_5, %c0_6] : memref<16x128xf32, #tpu.memory_space<vmem>>, vector<16x128xf32>
    tpu.vector_store %arg4[%c0_5, %c0_6], %6 {strides = array<i32>} : memref<16x128xf32, #tpu.memory_space<vmem>>, vector<16x128xf32>,
    return
  }
  func.func @transform_0(%arg0: i32) -> (i32, i32) {
    %c0_i32 = arith.constant 0 : i32
    %c0_i32_0 = arith.constant 0 : i32
    return %arg0, %c0_i32 : i32, i32
  }
  func.func @transform_1(%arg0: i32) -> (i32, i32) {
    %c0_i32 = arith.constant 0 : i32
    %c0_i32_0 = arith.constant 0 : i32
    %c0_i32_1 = arith.constant 0 : i32
    return %c0_i32, %c0_i32_0 : i32, i32
  }
  func.func @transform_2(%arg0: i32) -> (i32, i32) {
    %c0_i32 = arith.constant 0 : i32
    %c0_i32_0 = arith.constant 0 : i32
    %c0_i32_1 = arith.constant 0 : i32
    return %c0_i32, %c0_i32_0 : i32, i32
  }
  func.func @transform_3(%arg0: i32) -> (i32, i32) {
    %c0_i32 = arith.constant 0 : i32
    %c0_i32_0 = arith.constant 0 : i32
    return %arg0, %c0_i32 : i32, i32
  }
}

module attributes {stable_mosaic.version = 11 : i64} {
  func.func @spmm_combine_kernel(%arg0: i32, %arg1: memref<2xi32, #tpu.memory_space<smem>>, %arg2: memref<32xi32, #tpu.memory_space<smem>>, %arg3: memref<32xi32, #tpu.memory_space<smem>>, %arg4: memref<32xf32, #tpu.memory_space<smem>>, %arg5: memref<16x128xf32, #tpu.memory_space<vmem>>, %arg6: memref<16x128xf32, #tpu.memory_space<vmem>>, %arg7: memref<16x1xf32, #tpu.memory_space<vmem>>, %arg8: memref<16x128xf32, #tpu.memory_space<any>>, %arg9: memref<16x128xf32, #tpu.memory_space<vmem>>, %arg10: memref<16x128xf32, #tpu.memory_space<vmem>>, %arg11: memref<2x1x128xf32, #tpu.memory_space<vmem>>, %arg12: memref<2x!tpu.dma_semaphore, #tpu.memory_space<semaphore_mem>>) attributes {dimension_semantics = [#tpu.dimension_semantics<parallel>], iteration_bounds = array<i64: 1>, scalar_prefetch = 0 : i64, scratch_operands = 3 : i64, tpu.core_type = #tpu.core_type<tc>, window_params = [{transform_indices = @transform_0, window_bounds = array<i64: 2>}, {transform_indices = @transform_1, window_bounds = array<i64: 32>}, {transform_indices = @transform_2, window_bounds = array<i64: 32>}, {transform_indices = @transform_3, window_bounds = array<i64: 32>}, {transform_indices = @transform_4, window_bounds = array<i64: 16, 128>}, {transform_indices = @transform_5, window_bounds = array<i64: 16, 128>}, {transform_indices = @transform_6, window_bounds = array<i64: 16, 1>}, {}, {transform_indices = @transform_8, window_bounds = array<i64: 16, 128>}]} {
    %c16_i32 = arith.constant 16 : i32
    %0 = arith.muli %arg0, %c16_i32 : i32
    %1 = arith.index_cast %arg0 : i32 to index
    %2 = memref.load %arg1[%1] : memref<2xi32, #tpu.memory_space<smem>>
    %c1_i32 = arith.constant 1 : i32
    %3 = arith.addi %arg0, %c1_i32 : i32
    %4 = arith.index_cast %3 : i32 to index
    %5 = memref.load %arg1[%4] : memref<2xi32, #tpu.memory_space<smem>>
    %6 = arith.subi %5, %2 : i32
    %cst = arith.constant 0.000000e+00 : f32
    %7 = vector.broadcast %cst : f32 to vector<16x128xf32>
    %c0 = arith.constant 0 : index
    %c0_0 = arith.constant 0 : index
    %8 = vector.load %arg10[%c0, %c0_0] : memref<16x128xf32, #tpu.memory_space<vmem>>, vector<16x128xf32>
    tpu.vector_store %arg10[%c0, %c0_0], %7 {strides = array<i32>} : memref<16x128xf32, #tpu.memory_space<vmem>>, vector<16x128xf32>,
    %c0_i32 = arith.constant 0 : i32
    %9 = arith.cmpi sgt, %6, %c0_i32 : i32
    %10 = arith.extui %9 : i1 to i32
    %c0_i32_1 = arith.constant 0 : i32
    %11 = arith.cmpi ne, %10, %c0_i32_1 : i32
    scf.if %11 {
      %c0_i32_16 = arith.constant 0 : i32
      %25 = arith.addi %2, %c0_i32_16 : i32
      %26 = arith.index_cast %25 : i32 to index
      %27 = memref.load %arg3[%26] : memref<32xi32, #tpu.memory_space<smem>>
      %c0_i32_17 = arith.constant 0 : i32
      %c0_i32_18 = arith.constant 0 : i32
      %c0_i32_19 = arith.constant 0 : i32
      %28 = tpu.memref_slice %arg8[%27, %c0_i32_19] : memref<16x128xf32, #tpu.memory_space<any>> -> memref<1x128xf32, #tpu.memory_space<any>>
      %c0_i32_20 = arith.constant 0 : i32
      %c0_i32_21 = arith.constant 0 : i32
      %29 = tpu.memref_slice %arg11[%c0_i32_17, %c0_i32_20, %c0_i32_21] : memref<2x1x128xf32, #tpu.memory_space<vmem>> -> memref<1x1x128xf32, #tpu.memory_space<vmem>>
      %30 = tpu.memref_squeeze %29 : memref<1x1x128xf32, #tpu.memory_space<vmem>> -> memref<1x128xf32, #tpu.memory_space<vmem>>
      %31 = tpu.memref_slice %arg12[%c0_i32_18] : memref<2x!tpu.dma_semaphore, #tpu.memory_space<semaphore_mem>> -> memref<1x!tpu.dma_semaphore, #tpu.memory_space<semaphore_mem>>
      %32 = tpu.memref_squeeze %31 : memref<1x!tpu.dma_semaphore, #tpu.memory_space<semaphore_mem>> -> memref<!tpu.dma_semaphore, #tpu.memory_space<semaphore_mem>>
      tpu.enqueue_dma source(%28 : memref<1x128xf32, #tpu.memory_space<any>>) target(%30 : memref<1x128xf32, #tpu.memory_space<vmem>>) target_semaphore(%32 : memref<!tpu.dma_semaphore, #tpu.memory_space<semaphore_mem>>)
    } else {
    }
    %c0_i32_2 = arith.constant 0 : i32
    %c0_i32_3 = arith.constant 0 : i32
    %12 = arith.subi %6, %c0_i32_3 : i32
    %13 = arith.addi %c0_i32_3, %12 : i32
    %c1_i32_4 = arith.constant 1 : i32
    scf.for %arg13 = %c0_i32_3 to %13 step %c1_i32_4  : i32 {
      %c2_i32 = arith.constant 2 : i32
      %c0_i32_16 = arith.constant 0 : i32
      %25 = arith.cmpi eq, %c2_i32, %c0_i32_16 : i32
      %c1_i32_17 = arith.constant 1 : i32
      %26 = arith.select %25, %c1_i32_17, %c2_i32 : i32
      %27 = arith.remsi %arg13, %26 : i32
      %c0_i32_18 = arith.constant 0 : i32
      %28 = arith.cmpi ne, %27, %c0_i32_18 : i32
      %c0_i32_19 = arith.constant 0 : i32
      %29 = arith.cmpi slt, %27, %c0_i32_19 : i32
      %c0_i32_20 = arith.constant 0 : i32
      %30 = arith.cmpi slt, %26, %c0_i32_20 : i32
      %31 = arith.xori %29, %30 : i1
      %32 = arith.andi %31, %28 : i1
      %33 = arith.addi %27, %26 : i32
      %34 = arith.select %32, %33, %27 : i32
      %c0_i32_21 = arith.constant 0 : i32
      %c0_i32_22 = arith.constant 0 : i32
      %35 = tpu.memref_slice %arg8[%c0_i32_21, %c0_i32_22] : memref<16x128xf32, #tpu.memory_space<any>> -> memref<1x128xf32, #tpu.memory_space<any>>
      %c0_i32_23 = arith.constant 0 : i32
      %c0_i32_24 = arith.constant 0 : i32
      %36 = tpu.memref_slice %arg11[%34, %c0_i32_23, %c0_i32_24] : memref<2x1x128xf32, #tpu.memory_space<vmem>> -> memref<1x1x128xf32, #tpu.memory_space<vmem>>
      %37 = tpu.memref_squeeze %36 : memref<1x1x128xf32, #tpu.memory_space<vmem>> -> memref<1x128xf32, #tpu.memory_space<vmem>>
      %38 = tpu.memref_slice %arg12[%34] : memref<2x!tpu.dma_semaphore, #tpu.memory_space<semaphore_mem>> -> memref<1x!tpu.dma_semaphore, #tpu.memory_space<semaphore_mem>>
      %39 = tpu.memref_squeeze %38 : memref<1x!tpu.dma_semaphore, #tpu.memory_space<semaphore_mem>> -> memref<!tpu.dma_semaphore, #tpu.memory_space<semaphore_mem>>
      tpu.wait_dma2 semaphore(%39 : memref<!tpu.dma_semaphore, #tpu.memory_space<semaphore_mem>>) src(%35 : memref<1x128xf32, #tpu.memory_space<any>>) dst(%37 : memref<1x128xf32, #tpu.memory_space<vmem>>)
      %c1_i32_25 = arith.constant 1 : i32
      %40 = arith.addi %arg13, %c1_i32_25 : i32
      %41 = arith.cmpi slt, %40, %6 : i32
      %42 = arith.extui %41 : i1 to i32
      %c0_i32_26 = arith.constant 0 : i32
      %43 = arith.cmpi ne, %42, %c0_i32_26 : i32
      scf.if %43 {
        %c1_i32_31 = arith.constant 1 : i32
        %61 = arith.addi %arg13, %c1_i32_31 : i32
        %c1_i32_32 = arith.constant 1 : i32
        %62 = arith.subi %c1_i32_32, %34 : i32
        %63 = arith.addi %2, %61 : i32
        %64 = arith.index_cast %63 : i32 to index
        %65 = memref.load %arg3[%64] : memref<32xi32, #tpu.memory_space<smem>>
        %c0_i32_33 = arith.constant 0 : i32
        %66 = tpu.memref_slice %arg8[%65, %c0_i32_33] : memref<16x128xf32, #tpu.memory_space<any>> -> memref<1x128xf32, #tpu.memory_space<any>>
        %c0_i32_34 = arith.constant 0 : i32
        %c0_i32_35 = arith.constant 0 : i32
        %67 = tpu.memref_slice %arg11[%62, %c0_i32_34, %c0_i32_35] : memref<2x1x128xf32, #tpu.memory_space<vmem>> -> memref<1x1x128xf32, #tpu.memory_space<vmem>>
        %68 = tpu.memref_squeeze %67 : memref<1x1x128xf32, #tpu.memory_space<vmem>> -> memref<1x128xf32, #tpu.memory_space<vmem>>
        %69 = tpu.memref_slice %arg12[%62] : memref<2x!tpu.dma_semaphore, #tpu.memory_space<semaphore_mem>> -> memref<1x!tpu.dma_semaphore, #tpu.memory_space<semaphore_mem>>
        %70 = tpu.memref_squeeze %69 : memref<1x!tpu.dma_semaphore, #tpu.memory_space<semaphore_mem>> -> memref<!tpu.dma_semaphore, #tpu.memory_space<semaphore_mem>>
        tpu.enqueue_dma source(%66 : memref<1x128xf32, #tpu.memory_space<any>>) target(%68 : memref<1x128xf32, #tpu.memory_space<vmem>>) target_semaphore(%70 : memref<!tpu.dma_semaphore, #tpu.memory_space<semaphore_mem>>)
      } else {
      }
      %44 = arith.addi %2, %arg13 : i32
      %45 = arith.index_cast %44 : i32 to index
      %46 = memref.load %arg4[%45] : memref<32xf32, #tpu.memory_space<smem>>
      %47 = arith.addi %2, %arg13 : i32
      %48 = arith.index_cast %47 : i32 to index
      %49 = memref.load %arg2[%48] : memref<32xi32, #tpu.memory_space<smem>>
      %50 = arith.subi %49, %0 : i32
      %51 = arith.index_cast %50 : i32 to index
      %c0_27 = arith.constant 0 : index
      %52 = vector.load %arg10[%51, %c0_27] : memref<16x128xf32, #tpu.memory_space<vmem>>, vector<1x128xf32>
      %53 = arith.index_cast %34 : i32 to index
      %c0_28 = arith.constant 0 : index
      %c0_29 = arith.constant 0 : index
      %54 = vector.load %arg11[%53, %c0_28, %c0_29] : memref<2x1x128xf32, #tpu.memory_space<vmem>>, vector<1x1x128xf32>
      %55 = vector.shape_cast %54 : vector<1x1x128xf32> to vector<1x128xf32>
      %56 = vector.broadcast %46 : f32 to vector<1x128xf32>
      %57 = arith.mulf %56, %55 : vector<1x128xf32>
      %58 = arith.addf %52, %57 : vector<1x128xf32>
      %59 = arith.index_cast %50 : i32 to index
      %c0_30 = arith.constant 0 : index
      %60 = vector.load %arg10[%59, %c0_30] : memref<16x128xf32, #tpu.memory_space<vmem>>, vector<1x128xf32>
      tpu.vector_store %arg10[%59, %c0_30], %58 {strides = array<i32>} : memref<16x128xf32, #tpu.memory_space<vmem>>, vector<1x128xf32>,
    }
    %c0_5 = arith.constant 0 : index
    %c0_6 = arith.constant 0 : index
    %14 = vector.load %arg5[%c0_5, %c0_6] : memref<16x128xf32, #tpu.memory_space<vmem>>, vector<16x128xf32>
    %c0_7 = arith.constant 0 : index
    %c0_8 = arith.constant 0 : index
    %15 = vector.load %arg7[%c0_7, %c0_8] : memref<16x1xf32, #tpu.memory_space<vmem>>, vector<16x1xf32>
    %c0_9 = arith.constant 0 : index
    %c0_10 = arith.constant 0 : index
    %16 = vector.load %arg6[%c0_9, %c0_10] : memref<16x128xf32, #tpu.memory_space<vmem>>, vector<16x128xf32>
    %17 = vector.broadcast %15 : vector<16x1xf32> to vector<16x128xf32>
    %18 = arith.mulf %17, %16 : vector<16x128xf32>
    %c0_11 = arith.constant 0 : index
    %c0_12 = arith.constant 0 : index
    %19 = vector.load %arg10[%c0_11, %c0_12] : memref<16x128xf32, #tpu.memory_space<vmem>>, vector<16x128xf32>
    %20 = arith.addf %18, %19 : vector<16x128xf32>
    %cst_13 = arith.constant 1.000000e+00 : f32
    %21 = vector.broadcast %cst_13 : f32 to vector<16x128xf32>
    %22 = arith.mulf %21, %20 : vector<16x128xf32>
    %23 = arith.subf %14, %22 : vector<16x128xf32>
    %c0_14 = arith.constant 0 : index
    %c0_15 = arith.constant 0 : index
    %24 = vector.load %arg9[%c0_14, %c0_15] : memref<16x128xf32, #tpu.memory_space<vmem>>, vector<16x128xf32>
    tpu.vector_store %arg9[%c0_14, %c0_15], %23 {strides = array<i32>} : memref<16x128xf32, #tpu.memory_space<vmem>>, vector<16x128xf32>,
    return
  }
  func.func @transform_0(%arg0: i32) -> i32 {
    %c0_i32 = arith.constant 0 : i32
    %c0_i32_0 = arith.constant 0 : i32
    return %c0_i32 : i32
  }
  func.func @transform_1(%arg0: i32) -> i32 {
    %c0_i32 = arith.constant 0 : i32
    %c0_i32_0 = arith.constant 0 : i32
    return %c0_i32 : i32
  }
  func.func @transform_2(%arg0: i32) -> i32 {
    %c0_i32 = arith.constant 0 : i32
    %c0_i32_0 = arith.constant 0 : i32
    return %c0_i32 : i32
  }
  func.func @transform_3(%arg0: i32) -> i32 {
    %c0_i32 = arith.constant 0 : i32
    %c0_i32_0 = arith.constant 0 : i32
    return %c0_i32 : i32
  }
  func.func @transform_4(%arg0: i32) -> (i32, i32) {
    %c0_i32 = arith.constant 0 : i32
    %c0_i32_0 = arith.constant 0 : i32
    return %arg0, %c0_i32 : i32, i32
  }
  func.func @transform_5(%arg0: i32) -> (i32, i32) {
    %c0_i32 = arith.constant 0 : i32
    %c0_i32_0 = arith.constant 0 : i32
    return %arg0, %c0_i32 : i32, i32
  }
  func.func @transform_6(%arg0: i32) -> (i32, i32) {
    %c0_i32 = arith.constant 0 : i32
    %c0_i32_0 = arith.constant 0 : i32
    return %arg0, %c0_i32 : i32, i32
  }
  func.func @transform_8(%arg0: i32) -> (i32, i32) {
    %c0_i32 = arith.constant 0 : i32
    %c0_i32_0 = arith.constant 0 : i32
    return %arg0, %c0_i32 : i32, i32
  }
}

</mosaic_0001>

<bundles_post_ra>
// kernel: forward.4
= control target key start
LH: loop header
LB: loop body
LE: loop exit
PB: predicated region body
PF: predicated region fallthrough
CT: control target
= control target key end

     0   :  { %v184_v0 = vmov 0.0   ;;  %vm185_vm0 = vmmov 0   ;;  %s245_s1 = inlined_call_operand.vmem [shape: bf16[128,128], index: 1, kind: input, shape index: {}]   ;;  %s246_s0 = inlined_call_operand.vmem [shape: f32[16,128], index: 0, kind: input, shape index: {}]   ;;  %s247_s2 = inlined_call_operand.vmem [shape: f32[1,128], index: 2, kind: input, shape index: {}]   ;;  %s248_s3 = inlined_call_operand.vmem [shape: f32[16,128], index: 3, kind: output, shape index: {}]  }
   0x1   :  { %154 = vmatprep.subr.bf16.mxu0 %v184_v0  ;;  %v176_v1 = vld [vmem:[%s245_s1] sm:$0xff]   ;;  %170 = vmatprep.mubr.msk.bf16.mxu0 %vm185_vm0, %v184_v0  ;;  %v177_v2 = vld [vmem:[%s245_s1 + $0x8] sm:$0xff]   ;;  %v178_v3 = vld [vmem:[%s245_s1 + $0x10] sm:$0xff]  }
   0x2   :  { %155 = vmatpush3.bf16.msra.mxu0 %v176_v1  ;;  %v179_v4 = vld [vmem:[%s245_s1 + $0x18] sm:$0xff]   ;;  %v180_v5 = vld [vmem:[%s245_s1 + $0x20] sm:$0xff]   ;;  %v181_v6 = vld [vmem:[%s245_s1 + $0x28] sm:$0xff]  }
   0x3   :  { %156 = vmatprep.subr.bf16.mxu0 %v184_v0  ;;  %v182_v7 = vld [vmem:[%s245_s1 + $0x30] sm:$0xff]   ;;  %v183_v8 = vld [vmem:[%s245_s1 + $0x38] sm:$0xff]   ;;  %v15_v9 = vld [vmem:[%s246_s0] sm:$0xff] }
   0x4   :  { %v16_v10 = vld [vmem:[%s246_s0 + $0x8] sm:$0xff]  ;;  %v136_v12 = vld [vmem:[%s247_s2] ss:$0 sm:$0xff] }
   0x5   :  { %v17_v11 = vpack.c.bf16 %v16_v10, %v15_v9 }
   0x6   :  { %157 = vmatpush3.bf16.msra.mxu0 %v177_v2 }
   0x7   :  { %158 = vmatprep.subr.bf16.mxu0 %v184_v0 }
   0xa   :  { %159 = vmatpush3.bf16.msra.mxu0 %v178_v3 }
   0xb   :  { %160 = vmatprep.subr.bf16.mxu0 %v184_v0 }
   0xe   :  { %161 = vmatpush3.bf16.msra.mxu0 %v179_v4 }
   0xf   :  { %162 = vmatprep.subr.bf16.mxu0 %v184_v0 }
  0x12   :  { %163 = vmatpush3.bf16.msra.mxu0 %v180_v5 }
  0x13   :  { %164 = vmatprep.subr.bf16.mxu0 %v184_v0 }
  0x16   :  { %165 = vmatpush3.bf16.msra.mxu0 %v181_v6 }
  0x17   :  { %166 = vmatprep.subr.bf16.mxu0 %v184_v0 }
  0x1a   :  { %167 = vmatpush3.bf16.msra.mxu0 %v182_v7 }
  0x1b   :  { %168 = vmatprep.subr.bf16.mxu0 %v184_v0 }
  0x1e   :  { %169 = vmatpush3.bf16.msra.mxu0 %v183_v8 }
  0x21   :  { %171 = vmatmul.mubr.bf16.vlgmr.msra.gmra.mrb[0].mxu0 %v17_v11 }
  0xf4   :  { %v123_v13 = vpop.f32.mrb[0].mxu0 }
  0xf5   :  { %v124_v14 = vadd.f32 %v136_v12, %v123_v13  ;;  %v172_v15 = vpop.f32.mrb[1].mxu0 }
  0xf6   :  { %v126_v16 = vpop.f32.mrb[2].mxu0 }
  0xf7   :  { %130 = vst [vmem:[%s248_s3] sm:$0xff] %v124_v14  ;;  %v127_v17 = vadd.f32 %v136_v12, %v126_v16  ;;  %v173_v18 = vpop.f32.mrb[3].mxu0 }
  0xf9   :  { %131 = vst [vmem:[%s248_s3 + $0x8] sm:$0xff] %v127_v17 }

// kernel: forward.5
= control target key start
LH: loop header
LB: loop body
LE: loop exit
PB: predicated region body
PF: predicated region fallthrough
CT: control target
= control target key end

     0   :  { %13 = vsyncpa [#allocation6], 0  ;;  %s499_s0 = inlined_call_operand.vmem [shape: s32[2], index: 0, kind: input, shape index: {}]   ;;  %s500_s1 = inlined_call_operand.vmem [shape: s32[32], index: 1, kind: input, shape index: {}]   ;;  %s501_s2 = inlined_call_operand.vmem [shape: s32[32], index: 2, kind: input, shape index: {}]   ;;  %s502_s3 = inlined_call_operand.vmem [shape: f32[32], index: 3, kind: input, shape index: {}]   ;;  %s503_s4 = inlined_call_operand.vmem [shape: f32[16,128], index: 4, kind: input, shape index: {}]   ;;  %s504_s5 = inlined_call_operand.vmem [shape: f32[16,128], index: 5, kind: input, shape index: {}, may-alias: {5,7}]   ;;  %s505_s6 = inlined_call_operand.vmem [shape: f32[16,1], index: 6, kind: input, shape index: {}]   ;;  %s506_s7 = inlined_call_operand.vmem [shape: f32[16,128], index: 7, kind: input, shape index: {}, may-alias: {5,7}]   ;;  %s507_s8 = inlined_call_operand.vmem [shape: f32[16,128], index: 8, kind: output, shape index: {}]  }
   0x1   :  { %14 = vsyncpa [#allocation8], 0  ;;  %s32_s29 = sshll.u32 %s500_s1, 4  ;;  %s33_s29 = int_to_ptr.vmem [resolvable:$true] %s32_s29 }
   0x2   :  { %15 = vsyncpa [#allocation11], 0  ;;  %s22_s10 = sshll.u32 %s499_s0, 4  ;;  %s323_s11 = scalar_lea.vmem %s33_s29, 16  ;;  %s23_s10 = int_to_ptr.vmem [resolvable:$true] %s22_s10 }
   0x3   :  { %p324_p0 = scmp.ne.s32.totalorder %s33_s29, %s323_s11  ;;  %p328_p1 = scmp.lt.s32.totalorder %s33_s29, %s33_s29 }
   0x4   :  { %p329_p2 = scmp.lt.s32.totalorder %s323_s11, %s323_s11 }
   0x6   :  { %p330_p3 = por %p329_p2, %p328_p1 }
   0x8   :  { %p331_p4 = pnand %p330_p3, %p324_p0 }
   0xa   :  { %334 = shalt.err (!%p331_p4)
}
   0xb   :  { %s387_s12 = smov [#allocation7]   ;;  %s335_s13 = scalar_lea.vmem %s23_s10, 16 }
   0xc   :  { %35 = dma.vmem_to_smem %s33_s29, 16, %s387_s12, [#allocation8]  }
   0xd   :  { %p336_p5 = scmp.ne.s32.totalorder %s23_s10, %s335_s13  ;;  %p340_p6 = scmp.lt.s32.totalorder %s23_s10, %s23_s10 }
   0xe   :  { %p341_p7 = scmp.lt.s32.totalorder %s335_s13, %s335_s13 }
  0x10   :  { %p342_p8 = por %p341_p7, %p340_p6 }
  0x12   :  { %p343_p9 = pnand %p342_p8, %p336_p5 }
  0x14   :  { %346 = shalt.err (!%p343_p9)
}
  0x15   :  { %s388_s1 = smov [#allocation5]   ;;  %s42_s15 = sshll.u32 %s501_s2, 4  ;;  %s43_s15 = int_to_ptr.vmem [resolvable:$true] %s42_s15 }
  0x16   :  { %25 = dma.vmem_to_smem %s23_s10, 16, %s388_s1, [#allocation6]  }
  0x17   :  { %s52_s18 = sshll.u32 %s502_s3, 4  ;;  %s347_s19 = scalar_lea.vmem %s43_s15, 16  ;;  %s53_s18 = int_to_ptr.vmem [resolvable:$true] %s52_s18 }
  0x18   :  { %p348_p10 = scmp.ne.s32.totalorder %s43_s15, %s347_s19  ;;  %p352_p11 = scmp.lt.s32.totalorder %s43_s15, %s43_s15 }
  0x19   :  { %p353_p12 = scmp.lt.s32.totalorder %s347_s19, %s347_s19 }
  0x1b   :  { %p354_p13 = por %p353_p12, %p352_p11 }
  0x1d   :  { %p355_p0 = pnand %p354_p13, %p348_p10 }
  0x1f   :  { %358 = shalt.err (!%p355_p0)
}
  0x20   :  { %s389_s20 = smov [#allocation9]   ;;  %s359_s21 = scalar_lea.vmem %s53_s18, 16 }
  0x21   :  { %45 = dma.vmem_to_smem %s43_s15, 16, %s389_s20, [#allocation8]  }
  0x22   :  { %p360_p1 = scmp.ne.s32.totalorder %s53_s18, %s359_s21  ;;  %p364_p2 = scmp.lt.s32.totalorder %s53_s18, %s53_s18 }
  0x23   :  { %p365_p3 = scmp.lt.s32.totalorder %s359_s21, %s359_s21 }
  0x25   :  { %p366_p4 = por %p365_p3, %p364_p2 }
  0x27   :  { %p367_p5 = pnand %p366_p4, %p360_p1 }
  0x29   :  { %370 = shalt.err (!%p367_p5)
}
  0x2a   :  { %s390_s2 = smov [#allocation10]  }
  0x2b   :  { %55 = dma.vmem_to_smem %s53_s18, 16, %s390_s2, [#allocation11]  }
  0x2c   :  { %375 = dma.done.wait [#allocation6], 16  }
  0x2d   :  { %376 = vsyncadd [#allocation6], 4294967280 }
  0x2e   :  { %377 = dma.done.wait [#allocation8], 32  }
  0x2f   :  { %378 = vsyncadd [#allocation8], 4294967264 }
  0x30   :  { %379 = dma.done.wait [#allocation11], 16  }
  0x31   :  { %380 = vsyncadd [#allocation11], 4294967280 }
  0x32   :  { %74 = sfence }
  0x33   :  { %s450_s3 = sld [smem:[#allocation5]]  ;;  %s299_s22 = sld [smem:[#allocation5 + $0x1]]  ;;  %v391_v0 = vmov 0.0  }
  0x34   :  { %80 = vst [vmem:[#allocation2] sm:$0xff] %v391_v0  ;;  %81 = vst [vmem:[#allocation2 + $0x8] sm:$0xff] %v391_v0 }
  0x39   :  { %s453_s23 = ssub.s32 %s299_s22, %s450_s3 }
  0x3a   :  { %p300_p6 = scmp.le.s32.totalorder %s453_s23, 0 }
  0x3b   :  { %s86_s24 = sld [smem:[#allocation9 + %s450_s3]] (!%p300_p6) }
  0x3c   :  { %85 = sbr.rel (%p300_p6) target bundleno = 69 (0x45), region = 49 }
  0x41   :  { %s87_s27 = scalar_lea.vmem (!%p300_p6), %s506_s7, %s86_s24 }
  0x42   :  { %v105_v1 = vld [vmem:[%s87_s27] sm:$0x1] (!%p300_p6) }
  0x43   :  { %106 = vst [vmem:[#allocation3] sm:$0x1] %v105_v1 }
  0x44   :  { %131 = vsyncadd [#allocation4], 16 }
  0x45 PF:  { %296 = sbr.rel (%p300_p6) target bundleno = 112 (0x70), region = 161  ;;  %s460_s28 = smov (!%p300_p6), 0  }
  0x4c LB: > { %p138_p7 = scmp.lt.s32.totalorder %s385_s28, 0  ;;  %s139_s29 = ssub.s32 0, %s385_s28  ;;  %s385_s28 = sphi %s460_s28, %s508_s28  }
  0x4d   : > { %s302_s30 = smin.u32 %s385_s28, %s139_s29 }
  0x4e   : > { %s141_s9 = sand.u32 1, %s302_s30  }
  0x4f   : > { %s142_s10 = ssub.s32 0, %s141_s9 }
  0x50   : > { %s510_s10 = smov (!%p138_p7, %s142_s10), %s141_s9 }
  0x51   : > { %p304_p8 = scmp.lt.s32.totalorder %s510_s10, 0  ;;  %s148_s11 = sadd.s32 2, %s510_s10 }
  0x53   : > { %s512_s11 = smov (!%p304_p8, %s148_s11), %s510_s10 }
  0x54   : > { %s150_s12 = scalar_lea.vmem [#allocation3], %s512_s11  ;;  %s151_s13 = scalar_lea.sflag [#allocation4], %s512_s11 }
  0x55   : > { %381 = dma.done.wait %s151_s13, 16 }
  0x56   : > { %382 = vsyncadd %s151_s13, 4294967280  ;;  %s155_s1 = sadd.s32 1, %s385_s28  }
  0x57   : > { %p305_p9 = scmp.ge.s32.totalorder %s155_s1, %s453_s23 }
  0x58   : > { %s160_s0 = ssub.s32 (!%p305_p9), 1, %s512_s11  ;;  %s161_s14 = sadd.s32 (!%p305_p9), %s155_s1, %s450_s3 }
  0x59   : > { %159 = sbr.rel (%p305_p9) target bundleno = 99 (0x63), region = 90  ;;  %s162_s15 = sld [smem:[#allocation9 + %s161_s14]] (!%p305_p9) }
  0x5a   : > { %s164_s19 = scalar_lea.vmem (!%p305_p9), [#allocation3], %s160_s0  ;;  %s165_s20 = scalar_lea.sflag (!%p305_p9), [#allocation4], %s160_s0 }
  0x5f   : > { %s163_s18 = scalar_lea.vmem (!%p305_p9), %s506_s7, %s162_s15 }
  0x60   : > { %v183_v2 = vld [vmem:[%s163_s18] sm:$0x1] }
  0x61   : > { %184 = vst [vmem:[%s164_s19] sm:$0x1] %v183_v2 }
  0x62   : > { %209 = vsyncadd %s165_s20, 16 }
  0x63 PF: > { %s210_s21 = sadd.s32 %s385_s28, %s450_s3  ;;  %s508_s28 = smov %s155_s1 }
  0x64   : > { %s211_s2 = sld [smem:[#allocation10 + %s210_s21]] }
  0x65   : > { %s212_s22 = sld [smem:[#allocation7 + %s210_s21]] }
  0x68   : > { %v216_v3 = vld [vmem:[%s150_s12] sm:$0x1] }
  0x69   :  { %137 = sbr.rel (!%p305_p9) target bundleno = 76 (0x4c), region = 167 }
  0x6a   : > { %v217_v4 = vstv %s211_s2 }
  0x6b   : > { %s214_s24 = scalar_lea.vmem [#allocation2], %s212_s22  ;;  %v218_v6 = vmul.f32 %v217_v4, %v216_v3 }
  0x6c   : > { %v215_v5 = vld [vmem:[%s214_s24] sm:$0x1] }
  0x6d   : > { %v219_v7 = vadd.f32 %v218_v6, %v215_v5 }
  0x6f   : > { %220 = vst [vmem:[%s214_s24] sm:$0x1] %v219_v7 }
  0x70 PF:  { %v223_v8 = vld [vmem:[%s505_s6] sm:$0xff]  ;;  %v392_v9 = vmov 0   ;;  %v224_v10 = vld [vmem:[%s505_s6 + $0x8] sm:$0xff] }
  0x71   :  { %322 = vset.pattern.permute.xlu0 %v392_v9  ;;  %v225_v11 = vld [vmem:[%s504_s5] sm:$0xff]  ;;  %v226_v16 = vld [vmem:[%s504_s5 + $0x8] sm:$0xff] }
  0x72   :  { %229 = vperm.xlu0 %322, %v223_v8   ;;  %v221_v15 = vld [vmem:[%s503_s4] sm:$0xff]  ;;  %v222_v22 = vld [vmem:[%s503_s4 + $0x8] sm:$0xff] }
  0x76   :  { %234 = vperm.xlu0 %322, %v224_v10   ;;  %v239_v12 = vld [vmem:[#allocation2] sm:$0xff]  ;;  %v240_v18 = vld [vmem:[#allocation2 + $0x8] sm:$0xff] }
  0xf1   :  { %v230_v13 = vpop.permute.xlu0 %229 }
  0xf2   :  { %v237_v14 = vmul.f32 %v230_v13, %v225_v11 }
  0xf4   :  { %v241_v17 = vadd.f32 %v239_v12, %v237_v14 }
  0xf5   :  { %v235_v19 = vpop.permute.xlu0 %234 }
  0xf6   :  { %v243_v20 = vsub.f32 %v221_v15, %v241_v17  ;;  %v238_v21 = vmul.f32 %v235_v19, %v226_v16 }
  0xf8   :  { %245 = vst [vmem:[%s507_s8] sm:$0xff] %v243_v20  ;;  %v242_v23 = vadd.f32 %v240_v18, %v238_v21 }
  0xfa   :  { %v244_v24 = vsub.f32 %v222_v22, %v242_v23 }
  0xfc   :  { %246 = vst [vmem:[%s507_s8 + $0x8] sm:$0xff] %v244_v24 }
  0xfd   :  { %251 = vsyncpa [#allocation6], 1 }
  0xfe   :  { %252 = vsyncpa [#allocation8], 1 }
  0xff   :  { %253 = vsyncpa [#allocation11], 1 }
 0x100   :  { %254 = vsyncmov [#allocation4] }
 0x103   :  { %s255_s5 = vpop.sfrf %254 }
 0x104   :  { %p306_p10 = scmp.ne.s32.totalorder %s255_s5, 0 }
 0x106   :  { %259 = shalt.err (%p306_p10)  }
 0x107   :  { %261 = vsyncmov [#allocation4 + $0x1] }
 0x10a   :  { %s262_s0 = vpop.sfrf %261 }
 0x10b   :  { %p307_p11 = scmp.ne.s32.totalorder %s262_s0, 0 }
 0x10d   :  { %266 = shalt.err (%p307_p11)  }

</bundles_post_ra>
